<compile_context>
chip_gen: v7x
topology: tpu7x:2x2x1
jax: 0.10.0
libtpu: 0.0.40
codegen_flags: <defaults>
</compile_context>

<pallas_src>
import functools

import jax
import jax.numpy as jnp
from jax.experimental import pallas as pl
from jax.experimental.pallas import tpu as pltpu


_LANE = 128
_SUBLANE = 8
_TM_CAP = 512      # rows of x per tile
_TN_CAP = 1024     # output features per tile
_TK_CAP = 2048     # reduction chunk; K <= cap collapses to the single-K path


def _round_up(v: int, m: int) -> int:
    return ((v + m - 1) // m) * m


def _pick_tile(dim: int, cap: int, align: int) -> int:
    """Largest aligned tile <= cap covering the dim with minimal pad waste."""
    dim_a = _round_up(dim, align)
    if dim_a <= cap:
        return dim_a
    nblocks = -(-dim_a // cap)
    return _round_up(-(-dim // nblocks), align)


# ----------------------------------------------------------------------------
# Kernels
# ----------------------------------------------------------------------------
def _linear_sigmoid_kernel_1k(x_ref, w_ref, b_ref, o_ref):
    # Single reduction step: z = x @ w_t + b, y = sigmoid(z).
    z = jnp.dot(x_ref[...], w_ref[...], preferred_element_type=jnp.float32)
    z = z + b_ref[...]
    o_ref[...] = (0.5 * jnp.tanh(0.5 * z) + 0.5).astype(o_ref.dtype)


def _linear_sigmoid_kernel_mk(x_ref, w_ref, b_ref, o_ref):
    # Multi-step reduction: accumulate directly into the resident f32 output
    # block (no scratch).  Bias is folded into the k==0 init.
    k = pl.program_id(2)

    @pl.when(k == 0)
    def _init():
        o_ref[...] = jnp.broadcast_to(b_ref[...], o_ref.shape)

    o_ref[...] += jnp.dot(
        x_ref[...], w_ref[...], preferred_element_type=jnp.float32
    )

    @pl.when(k == pl.num_programs(2) - 1)
    def _finalize():
        # sigmoid(z) = 0.5 * tanh(0.5 * z) + 0.5  (single EUP op, exact)
        o_ref[...] = 0.5 * jnp.tanh(0.5 * o_ref[...]) + 0.5


# ----------------------------------------------------------------------------
# Forward (jitted; weight is already relayouted/padded)
# ----------------------------------------------------------------------------
@functools.partial(
    jax.jit, static_argnames=("n_output", "tm_cap", "tn", "tk", "use_bf16")
)
def _forward(x, w_t, b2d, *, n_output, tm_cap, tn, tk, use_bf16):
    M, K = x.shape
    Kp, Np = w_t.shape

    tm = _pick_tile(M, tm_cap, _SUBLANE)
    Mp = _round_up(M, tm)

    xp = x.astype(jnp.bfloat16) if use_bf16 else x
    if (Mp, Kp) != (M, K):
        xp = jnp.pad(xp, ((0, Mp - M), (0, Kp - K)))

    nm, nn, nk = Mp // tm, Np // tn, Kp // tk

    in_isz = xp.dtype.itemsize
    footprint = 2 * (tm * tk * in_isz + tk * tn * in_isz
                     + tn * 4 + tm * tn * 4)
    # Explicit scoped-VMEM limit: >= footprint + headroom, capped so it is
    # still valid on v7x's 64 MiB-per-TC VMEM (v5e/v6e have 128 MiB physical).
    vmem_limit = int(min(64 * 2**20, max(32 * 2**20, footprint + 16 * 2**20)))

    out_shape = jax.ShapeDtypeStruct((Mp, Np), jnp.float32)

    if nk == 1:
        # Fast path: K collapsed into one MXU step, no predication.
        grid = (nm, nn)
        in_specs = [
            pl.BlockSpec((tm, tk), lambda i, j: (i, 0)),   # x tile
            pl.BlockSpec((tk, tn), lambda i, j: (0, j)),   # w^T tile
            pl.BlockSpec((1, tn), lambda i, j: (0, j)),    # bias tile
        ]
        out_specs = pl.BlockSpec((tm, tn), lambda i, j: (i, j))
        kernel = _linear_sigmoid_kernel_1k
        dims = ("parallel", "parallel")
    else:
        grid = (nm, nn, nk)
        in_specs = [
            pl.BlockSpec((tm, tk), lambda i, j, k: (i, k)),   # x tile
            pl.BlockSpec((tk, tn), lambda i, j, k: (k, j)),   # w^T tile
            pl.BlockSpec((1, tn), lambda i, j, k: (0, j)),    # bias (k-invariant)
        ]
        out_specs = pl.BlockSpec((tm, tn), lambda i, j, k: (i, j))
        kernel = _linear_sigmoid_kernel_mk
        dims = ("parallel", "parallel", "arbitrary")

    out = pl.pallas_call(
        kernel,
        out_shape=out_shape,
        grid_spec=pltpu.PrefetchScalarGridSpec(
            num_scalar_prefetch=0,
            grid=grid,
            in_specs=in_specs,
            out_specs=out_specs,
        ),
        compiler_params=pltpu.CompilerParams(
            dimension_semantics=dims,
            vmem_limit_bytes=vmem_limit,
        ),
    )(xp, w_t, b2d)

    return out[:M, :n_output]


# ----------------------------------------------------------------------------
# Module wrapper: holds the pre-transposed / pre-padded parameters
# ----------------------------------------------------------------------------
class PallasLinearSigmoid:
    """y = sigmoid(x @ weight.T + bias), matching torch nn.Linear + nn.Sigmoid.

    The PyTorch-layout weight (n_output, n_input) is transposed to K-major and
    zero-padded ONCE here, so the per-call jitted forward never relayouts the
    weight in HBM.
    """

    def __init__(self, weight, bias, *, use_bf16_inputs=False,
                 tm_cap=_TM_CAP, tn_cap=_TN_CAP, tk_cap=_TK_CAP):
        n_output, n_input = weight.shape
        self.n_input = int(n_input)
        self.n_output = int(n_output)
        self.use_bf16 = bool(use_bf16_inputs)
        self.tm_cap = int(tm_cap)

        self.tn = _pick_tile(self.n_output, tn_cap, _LANE)
        self.tk = _pick_tile(self.n_input, tk_cap, _LANE)
        kp = _round_up(self.n_input, self.tk)
        np_ = _round_up(self.n_output, self.tn)

        in_dtype = jnp.bfloat16 if self.use_bf16 else jnp.float32
        w_t = jnp.asarray(weight, jnp.float32).T                       # (K, N)
        w_t = jnp.pad(w_t, ((0, kp - self.n_input), (0, np_ - self.n_output)))
        b2d = jnp.pad(jnp.asarray(bias, jnp.float32), (0, np_ - self.n_output))

        self.w_t = jax.device_put(w_t.astype(in_dtype))   # (Kp, Np), K-major
        self.b2d = jax.device_put(b2d.reshape(1, np_))    # (1, Np), f32

    def __call__(self, x):
        return _forward(
            x, self.w_t, self.b2d,
            n_output=self.n_output, tm_cap=self.tm_cap,
            tn=self.tn, tk=self.tk, use_bf16=self.use_bf16,
        )


# ----------------------------------------------------------------------------
# Self-test
# ----------------------------------------------------------------------------
def _run_case(batch, n_input, n_output, key, **model_kwargs):
    kx, kw, kb = jax.random.split(key, 3)
    x = jax.random.normal(kx, (batch, n_input), dtype=jnp.float32)
    bound = 1.0 / (n_input ** 0.5)
    weight = jax.random.uniform(
        kw, (n_output, n_input), minval=-bound, maxval=bound, dtype=jnp.float32
    )
    bias = jax.random.uniform(
        kb, (n_output,), minval=-bound, maxval=bound, dtype=jnp.float32
    )

    model = PallasLinearSigmoid(weight, bias, **model_kwargs)
    y = model(x)
    jax.block_until_ready(y)

    z_ref = jnp.dot(x, weight.T, precision=jax.lax.Precision.HIGHEST) + bias
    y_ref = jax.nn.sigmoid(z_ref)
    assert y.shape == y_ref.shape, (y.shape, y_ref.shape)
    assert jnp.allclose(y, y_ref, atol=1e-3, rtol=1e-3), (
        f"mismatch vs reference for shape {(batch, n_input, n_output)}"
    )


if __name__ == "__main__":
    key = jax.random.PRNGKey(0)
    k1, k2, k3 = jax.random.split(key, 3)

    # Tiny shape consistent with the module (single tile, single-K fast path).
    _run_case(batch=8, n_input=32, n_output=16, key=k1)

    # Modest shape, still single-K fast path with larger tiles.
    _run_case(batch=256, n_input=384, n_output=256, key=k2)

    # Force the multi-K accumulation path (tk capped at 128 -> nk = 3) to
    # exercise the resident-output accumulator + pl.when init/finalize.
    _run_case(batch=64, n_input=384, n_output=256, key=k3, tk_cap=128)

    print("KERNEL_OK")
</pallas_src>

<mosaic_0001>
module attributes {stable_mosaic.version = 11 : i64} {
  func.func @_linear_sigmoid_kernel_1k(%arg0: i32, %arg1: i32, %arg2: memref<8x128xf32, #tpu.memory_space<vmem>>, %arg3: memref<128x128xf32, #tpu.memory_space<vmem>>, %arg4: memref<1x128xf32, #tpu.memory_space<vmem>>, %arg5: memref<8x128xf32, #tpu.memory_space<vmem>>) attributes {dimension_semantics = [#tpu.dimension_semantics<parallel>, #tpu.dimension_semantics<parallel>], iteration_bounds = array<i64: 1, 1>, scalar_prefetch = 0 : i64, scratch_operands = 0 : i64, tpu.core_type = #tpu.core_type<tc>, window_params = [{transform_indices = @transform_0, window_bounds = array<i64: 8, 128>}, {transform_indices = @transform_1, window_bounds = array<i64: 128, 128>}, {transform_indices = @transform_2, window_bounds = array<i64: 1, 128>}, {transform_indices = @transform_3, window_bounds = array<i64: 8, 128>}]} {
    %c0 = arith.constant 0 : index
    %c0_0 = arith.constant 0 : index
    %0 = vector.load %arg2[%c0, %c0_0] : memref<8x128xf32, #tpu.memory_space<vmem>>, vector<8x128xf32>
    %c0_1 = arith.constant 0 : index
    %c0_2 = arith.constant 0 : index
    %1 = vector.load %arg3[%c0_1, %c0_2] : memref<128x128xf32, #tpu.memory_space<vmem>>, vector<128x128xf32>
    %cst = arith.constant dense<0.000000e+00> : vector<8x128xf32>
    %2 = tpu.matmul %0, %1, %cst {dimension_numbers = #tpu.dot_dimension_numbers<[1], [0], [0], [1], [0, 0, 1, 1], [], []>} : vector<8x128xf32>, vector<128x128xf32>, vector<8x128xf32> -> vector<8x128xf32>
    %c0_3 = arith.constant 0 : index
    %c0_4 = arith.constant 0 : index
    %3 = vector.load %arg4[%c0_3, %c0_4] : memref<1x128xf32, #tpu.memory_space<vmem>>, vector<1x128xf32>
    %4 = vector.broadcast %3 : vector<1x128xf32> to vector<8x128xf32>
    %5 = arith.addf %2, %4 : vector<8x128xf32>
    %cst_5 = arith.constant 5.000000e-01 : f32
    %6 = vector.broadcast %cst_5 : f32 to vector<8x128xf32>
    %7 = arith.mulf %6, %5 : vector<8x128xf32>
    %8 = math.tanh %7 : vector<8x128xf32>
    %cst_6 = arith.constant 5.000000e-01 : f32
    %9 = vector.broadcast %cst_6 : f32 to vector<8x128xf32>
    %10 = arith.mulf %9, %8 : vector<8x128xf32>
    %cst_7 = arith.constant 5.000000e-01 : f32
    %11 = vector.broadcast %cst_7 : f32 to vector<8x128xf32>
    %12 = arith.addf %10, %11 : vector<8x128xf32>
    %c0_8 = arith.constant 0 : index
    %c0_9 = arith.constant 0 : index
    %13 = vector.load %arg5[%c0_8, %c0_9] : memref<8x128xf32, #tpu.memory_space<vmem>>, vector<8x128xf32>
    tpu.vector_store %arg5[%c0_8, %c0_9], %12 {strides = array<i32>} : memref<8x128xf32, #tpu.memory_space<vmem>>, vector<8x128xf32>,
    return
  }
  func.func @transform_0(%arg0: i32, %arg1: i32) -> (i32, i32) {
    %c0_i32 = arith.constant 0 : i32
    %c0_i32_0 = arith.constant 0 : i32
    return %arg0, %c0_i32 : i32, i32
  }
  func.func @transform_1(%arg0: i32, %arg1: i32) -> (i32, i32) {
    %c0_i32 = arith.constant 0 : i32
    %c0_i32_0 = arith.constant 0 : i32
    return %c0_i32, %arg1 : i32, i32
  }
  func.func @transform_2(%arg0: i32, %arg1: i32) -> (i32, i32) {
    %c0_i32 = arith.constant 0 : i32
    %c0_i32_0 = arith.constant 0 : i32
    return %c0_i32, %arg1 : i32, i32
  }
  func.func @transform_3(%arg0: i32, %arg1: i32) -> (i32, i32) {
    %c0_i32 = arith.constant 0 : i32
    return %arg0, %arg1 : i32, i32
  }
}

</mosaic_0001>

<bundles_post_ra>
// kernel: _forward.1
= control target key start
LH: loop header
LB: loop body
LE: loop exit
PB: predicated region body
PF: predicated region fallthrough
CT: control target
= control target key end

     0   :  { %8 = vsyncpa [#allocation3], 0  ;;  %s334_s0 = inlined_call_operand.vmem [shape: f32[8,128], index: 0, kind: input, shape index: {}]   ;;  %s335_s1 = inlined_call_operand.hbm [shape: f32[128,128], index: 1, kind: input, shape index: {}]   ;;  %s336_s2 = inlined_call_operand.vmem [shape: f32[1,128], index: 2, kind: input, shape index: {}]   ;;  %s337_s3 = inlined_call_operand.hbm [shape: f32[8,128], index: 3, kind: output, shape index: {}]  }
   0x1   :  { %9 = vsyncpa [#allocation4], 0  ;;  %s277_s12 = smov [#allocation2]   ;;  %s229_s16 = scalar_lea.hbm %s335_s1, 2048 }
   0x2   :  { %s17_s13 = sshll.u32 %s277_s12, 4  ;;  %p230_p0 = scmp.ne.s32.totalorder %s335_s1, %s229_s16  ;;  %s18_s13 = int_to_ptr.vmem [resolvable:$true] %s17_s13 }
   0x3   :  { %p233_p1 = scmp.lt.u32.totalorder %s229_s16, %s335_s1 }
   0x5   :  { %p235_p2 = pnand %p233_p1, %p230_p0 }
   0x7   :  { %238 = shalt.err (!%p235_p2)
}
   0x8   :  { %s239_s21 = scalar_lea.vmem %s18_s13, 2048  ;;  %p244_p4 = scmp.lt.s32.totalorder %s18_s13, %s18_s13 }
   0x9   :  { %p240_p3 = scmp.ne.s32.totalorder %s18_s13, %s239_s21  ;;  %p245_p5 = scmp.lt.s32.totalorder %s239_s21, %s239_s21 }
   0xb   :  { %p246_p6 = por %p245_p5, %p244_p4 }
   0xd   :  { %p247_p7 = pnand %p246_p6, %p240_p3 }
   0xf   :  { %250 = shalt.err (!%p247_p7)
}
  0x10   :  { %s278_s22 = smov 128   ;;  %s279_s23 = smov 8  }
  0x11   :  { %23 = dma.hbm_to_vmem [thread:$0]  %s335_s1, 2048, %s18_s13, [#allocation3], %s278_s22, %s278_s22, %s279_s23  }
  0x12   :  { %273 = dma.done.wait [#allocation3], 2048  }
  0x13   :  { %274 = vsyncadd [#allocation3], 4294965248  ;;  %v280_v0 = vmov 0.0|0.0   ;;  %vm281_vm0 = vmmov 0   ;;  %v282_v1 = vmov 0.0   ;;  %v30_v2 = vld [vmem:[#allocation2] sm:$0xff] }
  0x14   :  { %196 = vmatprep.subr.bf16.mxu0 %v280_v0  ;;  %193 = vmatprep.mubr.msk.f32.mxu0 %vm281_vm0, %v282_v1  ;;  %v31_v3 = vld [vmem:[#allocation2 + $0x8] sm:$0xff]  ;;  %v32_v4 = vld [vmem:[#allocation2 + $0x10] sm:$0xff]  ;;  %v33_v6 = vld [vmem:[#allocation2 + $0x18] sm:$0xff]  ;;  %s283_s29 = smov [#allocation5]  }
  0x15   :  { %v197_v5 = vpack.c.bf16 %v31_v3, %v30_v2  ;;  %v200_v7 = vpack.c.bf16 %v33_v6, %v32_v4  ;;  %v34_v8 = vld [vmem:[#allocation2 + $0x20] sm:$0xff]  ;;  %v35_v9 = vld [vmem:[#allocation2 + $0x28] sm:$0xff]  ;;  %v36_v11 = vld [vmem:[#allocation2 + $0x30] sm:$0xff]  ;;  %s134_s30 = sshll.u32 %s283_s29, 4  ;;  %s135_s30 = int_to_ptr.vmem [resolvable:$true] %s134_s30 }
  0x16   :  { %v203_v10 = vpack.c.bf16 %v35_v9, %v34_v8  ;;  %v37_v12 = vld [vmem:[#allocation2 + $0x38] sm:$0xff]  ;;  %v38_v14 = vld [vmem:[#allocation2 + $0x40] sm:$0xff]  ;;  %v39_v15 = vld [vmem:[#allocation2 + $0x48] sm:$0xff]  ;;  %s251_s4 = scalar_lea.vmem %s135_s30, 128  ;;  %p256_p9 = scmp.lt.s32.totalorder %s135_s30, %s135_s30 }
  0x17   :  { %198 = vmatpush3.bf16.msra.mxu0 %v197_v5  ;;  %v206_v13 = vpack.c.bf16 %v37_v12, %v36_v11  ;;  %v209_v16 = vpack.c.bf16 %v39_v15, %v38_v14  ;;  %v40_v17 = vld [vmem:[#allocation2 + $0x50] sm:$0xff]  ;;  %v41_v18 = vld [vmem:[#allocation2 + $0x58] sm:$0xff]  ;;  %v42_v20 = vld [vmem:[#allocation2 + $0x60] sm:$0xff]  ;;  %p252_p8 = scmp.ne.s32.totalorder %s135_s30, %s251_s4  ;;  %p257_p10 = scmp.lt.s32.totalorder %s251_s4, %s251_s4 }
  0x18   :  { %199 = vmatprep.subr.bf16.mxu0 %v280_v0  ;;  %v212_v19 = vpack.c.bf16 %v41_v18, %v40_v17  ;;  %v43_v21 = vld [vmem:[#allocation2 + $0x68] sm:$0xff]  ;;  %v44_v23 = vld [vmem:[#allocation2 + $0x70] sm:$0xff]  ;;  %v45_v24 = vld [vmem:[#allocation2 + $0x78] sm:$0xff] }
  0x19   :  { %v215_v22 = vpack.c.bf16 %v43_v21, %v42_v20  ;;  %v218_v25 = vpack.c.bf16 %v45_v24, %v44_v23  ;;  %v29_v26 = vld [vmem:[%s334_s0] sm:$0xff]  ;;  %p258_p11 = por %p257_p10, %p256_p9 }
  0x1a   :  { %v143_v27 = vld [vmem:[%s336_s2] ss:$0 sm:$0xff] }
  0x1b   :  { %201 = vmatpush3.bf16.msra.mxu0 %v200_v7  ;;  %p259_p12 = pnand %p258_p11, %p252_p8 }
  0x1c   :  { %202 = vmatprep.subr.bf16.mxu0 %v280_v0 }
  0x1f   :  { %204 = vmatpush3.bf16.msra.mxu0 %v203_v10 }
  0x20   :  { %205 = vmatprep.subr.bf16.mxu0 %v280_v0 }
  0x23   :  { %207 = vmatpush3.bf16.msra.mxu0 %v206_v13 }
  0x24   :  { %208 = vmatprep.subr.bf16.mxu0 %v280_v0 }
  0x27   :  { %210 = vmatpush3.bf16.msra.mxu0 %v209_v16 }
  0x28   :  { %211 = vmatprep.subr.bf16.mxu0 %v280_v0 }
  0x2b   :  { %213 = vmatpush3.bf16.msra.mxu0 %v212_v19 }
  0x2c   :  { %214 = vmatprep.subr.bf16.mxu0 %v280_v0 }
  0x2f   :  { %216 = vmatpush3.bf16.msra.mxu0 %v215_v22 }
  0x30   :  { %217 = vmatprep.subr.bf16.mxu0 %v280_v0 }
  0x33   :  { %219 = vmatpush3.bf16.msra.mxu0 %v218_v25 }
  0x36   :  { %194 = vmatmul.mubr.f32.vlgmr.msra.gmra.mrb[0].mxu0 %v29_v26 }
 0x109   :  { %v119_v28 = vpop.f32.mrb[0].mxu0 }
 0x10a   :  { %v120_v29 = vadd.f32 %v143_v27, %v119_v28  ;;  %v195_v30 = vpop.f32.mrb[1].mxu0 }
 0x10c   :  { %v123_v31 = vmul.f32 0.5, %v120_v29 }
 0x10e   :  { %227 = vtanh.f32 %v123_v31 }
 0x118   :  { %v228_v32 = vpop.eup %227 }
 0x119   :  { %v125_v33 = vmul.f32 0.5, %v228_v32 }
 0x11b   :  { %v126_v34 = vadd.f32 0.5, %v125_v33 }
 0x11d   :  { %127 = vst [vmem:[#allocation5] sm:$0xff] %v126_v34 }
 0x11e   :  { %262 = shalt.err (!%p259_p12)
}
 0x11f   :  { %s263_s5 = scalar_lea.hbm %s337_s3, 128 }
 0x120   :  { %p264_p13 = scmp.ne.s32.totalorder %s337_s3, %s263_s5  ;;  %p267_p0 = scmp.lt.u32.totalorder %s263_s5, %s337_s3 }
 0x122   :  { %p269_p1 = pnand %p267_p0, %p264_p13 }
 0x124   :  { %272 = shalt.err (!%p269_p1)
}
 0x125   :  { %137 = dma.vmem_to_hbm [thread:$0]  %s135_s30, 128, %s337_s3, [#allocation4]  }
 0x126   :  { %275 = dma.done.wait [#allocation4], 128  }
 0x127   :  { %276 = vsyncadd [#allocation4], 4294967168 }
 0x128   :  { %141 = vsyncpa [#allocation3], 1 }
 0x129   :  { %142 = vsyncpa [#allocation4], 1 }

</bundles_post_ra>
